<compile_context>
chip_gen: v7x
topology: tpu7x:2x2x1
jax: 0.10.0
libtpu: 0.0.40
codegen_flags: <defaults>
</compile_context>

<pallas_src>
import jax
import jax.numpy as jnp
from jax.experimental import pallas as pl
from jax.experimental.pallas import tpu as pltpu


# ------------------------------------------------------------------ kernel ---

def _make_matmul_kernel(use_bias):
    """Tiled (B, K) @ (K, N) matmul with f32 accumulator scratch.

    Grid = (n_tiles, k_tiles); K (reduction) is the innermost, "arbitrary" axis.
    G already encodes the hypernet weight generation, so the generated weights are
    consumed directly by the MXU with no in-kernel relayout."""

    def kernel(g_ref, w_ref, *rest):
        if use_bias:
            bias_ref, o_ref, acc_ref = rest
        else:
            o_ref, acc_ref = rest

        k = pl.program_id(1)

        @pl.when(k == 0)
        def _():
            acc_ref[...] = jnp.zeros_like(acc_ref)

        acc_ref[...] += jnp.dot(g_ref[...], w_ref[...],
                                preferred_element_type=jnp.float32)

        @pl.when(k == pl.num_programs(1) - 1)
        def _():
            res = acc_ref[...]
            if use_bias:
                res = res + bias_ref[...]            # (1, TILE_N) broadcast add
            o_ref[...] = res.astype(o_ref.dtype)

    return kernel


# ------------------------------------------------------------------ params ---

def init_symlinear_edge_params(key, in_features, out_features, hyper_hidden,
                               num_layers):
    """Deterministic synthetic parameter init (shapes from the module __init__)."""
    ks = jax.random.split(key, 7)
    f32 = jnp.float32
    s = 1.0 / jnp.sqrt(jnp.float32(hyper_hidden))
    return {
        "embed": jax.random.normal(ks[0], (num_layers, hyper_hidden), f32) * s,
        "W1": jax.random.normal(ks[1], (hyper_hidden, hyper_hidden), f32) * s,
        "b1": jax.random.normal(ks[2], (1, hyper_hidden), f32) * 0.01,
        "Ww": jax.random.normal(ks[3], (hyper_hidden, in_features * out_features), f32) * s,
        "bw": jax.random.normal(ks[4], (1, in_features * out_features), f32) * 0.01,
        "Wb": jax.random.normal(ks[5], (hyper_hidden, out_features), f32) * s,
        "bb": jax.random.normal(ks[6], (1, out_features), f32) * 0.01,
    }


def _vmem_capacity_bytes():
    try:
        return int(pltpu.get_tpu_info().vmem_capacity_bytes)
    except Exception:
        return 128 * 1024 * 1024      # conservative fallback (v5e/v6e size)


def prepare_symlinear_edge_params(raw, in_features, out_features, hyper_hidden,
                                  use_bias=True, weight_dtype=jnp.bfloat16,
                                  weight_tile_budget_bytes=None,
                                  vmem_limit_bytes=None):
    """One-time parameter prep.

    Builds W_aug = [[Ww reshaped to (hh*in, out)], [bw reshaped to (in, out)]] padded to
    (K_pad, n_pad) and stored in `weight_dtype` (bf16 by default — the kernel is HBM
    bandwidth bound on streaming this slab).  Tile sizes are generation-aware."""
    cap = _vmem_capacity_bytes()
    if weight_tile_budget_bytes is None:
        # double-buffered weight tile budget: ~48 MiB on 128 MiB parts, ~24 MiB on v7x
        weight_tile_budget_bytes = (cap * 3) // 8
    if vmem_limit_bytes is None:
        vmem_limit_bytes = (cap * 3) // 4            # ~96 MiB / ~48 MiB

    dts = jnp.dtype(weight_dtype).itemsize
    n_pad = pl.cdiv(out_features, 128) * 128

    # --- output-feature tile: lane-dense, and >=2 tiles when possible so the
    #     "parallel" grid axis can shard across v7x's two TensorCores. ---
    tile_n = n_pad
    if n_pad >= 256:
        tile_n = max(128, ((n_pad // 2) // 128) * 128)
    max_tile_n = max(128, (weight_tile_budget_bytes // (2 * 128 * dts)) // 128 * 128)
    tile_n = min(tile_n, max_tile_n)
    while n_pad % tile_n:
        tile_n -= 128
    n_tiles = n_pad // tile_n

    # --- contraction tile over K = (hh+1)*in rows of [Ww; bw]; K-tiled with an
    #     accumulator when a single slab would not fit the double-buffered budget. ---
    k_raw = (hyper_hidden + 1) * in_features
    k_pad128 = pl.cdiv(k_raw, 128) * 128
    tk_max = max(128, (weight_tile_budget_bytes // (2 * tile_n * dts)) // 128 * 128)
    if tk_max >= k_pad128:
        tk = k_pad128
        k_pad = k_pad128
    else:
        tk = tk_max
        k_pad = pl.cdiv(k_raw, tk) * tk
    k_tiles = k_pad // tk

    # --- augmented weight slab (offline) ---
    pad_cols = n_pad - out_features
    ww2 = raw["Ww"].reshape(hyper_hidden, in_features, out_features)
    ww2 = ww2.reshape(hyper_hidden * in_features, out_features)
    bw2 = raw["bw"].reshape(in_features, out_features)
    w_aug = jnp.concatenate([ww2, bw2], axis=0)                      # (k_raw, out)
    w_aug = jnp.pad(w_aug, ((0, k_pad - k_raw), (0, pad_cols)))      # zero pad -> no effect
    w_aug = w_aug.astype(weight_dtype)

    prep = {
        "embed": raw["embed"], "W1": raw["W1"], "b1": raw["b1"],
        "W_aug": w_aug,
        "in_features": in_features, "out_features": out_features,
        "hyper_hidden": hyper_hidden,
        "tile_n": tile_n, "n_pad": n_pad, "n_tiles": n_tiles,
        "tk": tk, "k_pad": k_pad, "k_tiles": k_tiles, "k_raw": k_raw,
        "use_bias": use_bias, "weight_dtype": weight_dtype,
        "vmem_limit_bytes": int(vmem_limit_bytes),
    }
    if use_bias:
        prep["Wb"] = jnp.pad(raw["Wb"], ((0, 0), (0, pad_cols)))
        prep["bb"] = jnp.pad(raw["bb"], ((0, 0), (0, pad_cols)))
    return prep


# ----------------------------------------------------------------- forward ---

def sym_linear_edge_forward(prep, x, layer_idx):
    """Pallas implementation of SymLinearEdge.forward(x, layer_idx)."""
    in_features = prep["in_features"]
    out_features = prep["out_features"]
    hh = prep["hyper_hidden"]
    tile_n, n_pad, n_tiles = prep["tile_n"], prep["n_pad"], prep["n_tiles"]
    tk, k_pad, k_tiles, k_raw = prep["tk"], prep["k_pad"], prep["k_tiles"], prep["k_raw"]
    use_bias = prep["use_bias"]
    wdt = prep["weight_dtype"]
    B = x.shape[0]
    hp = jax.lax.Precision.HIGHEST

    # -- tiny hypernet trunk as XLA ops (hoisted out of the per-tile kernel body) --
    idx = jnp.asarray(layer_idx, jnp.int32)
    e = jax.lax.dynamic_slice_in_dim(prep["embed"], idx, 1, axis=0)          # (1, hh)
    h = jnp.tanh(jnp.dot(e, prep["W1"], precision=hp) + prep["b1"])          # (1, hh)

    # G = [reshape(h (x) x, (B, hh*in)), x]  so that
    #   G @ [[Ww(hh*in,out)],[bw(in,out)]] == x @ (h @ Ww + bw).reshape(in, out)
    g = (h.reshape(1, hh, 1) * x.reshape(B, 1, in_features)).reshape(B, hh * in_features)
    g = jnp.concatenate([g, x.astype(g.dtype)], axis=1)                      # (B, k_raw)
    if k_pad != k_raw:
        g = jnp.pad(g, ((0, 0), (0, k_pad - k_raw)))
    g = g.astype(wdt)

    in_specs = [
        pl.BlockSpec((B, tk), lambda j, k: (0, k)),             # G      (K-tiled)
        pl.BlockSpec((tk, tile_n), lambda j, k: (k, j)),        # W_aug  (streamed)
    ]
    inputs = [g, prep["W_aug"]]
    if use_bias:
        bias_vec = jnp.dot(h, prep["Wb"], precision=hp) + prep["bb"]         # (1, n_pad) f32
        in_specs.append(pl.BlockSpec((1, tile_n), lambda j, k: (0, j)))
        inputs.append(bias_vec)

    wdt_size = jnp.dtype(wdt).itemsize
    out_itemsize = jnp.dtype(x.dtype).itemsize
    flops = 2 * B * k_pad * n_pad
    bytes_accessed = (n_tiles * B * k_pad * wdt_size        # G re-read per N tile
                      + k_pad * n_pad * wdt_size            # weight slab (dominant)
                      + (4 * n_pad if use_bias else 0)
                      + B * n_pad * out_itemsize)

    out = pl.pallas_call(
        _make_matmul_kernel(use_bias),
        out_shape=jax.ShapeDtypeStruct((B, n_pad), x.dtype),
        grid_spec=pltpu.PrefetchScalarGridSpec(
            num_scalar_prefetch=0,
            grid=(n_tiles, k_tiles),
            in_specs=in_specs,
            out_specs=pl.BlockSpec((B, tile_n), lambda j, k: (0, j)),
            scratch_shapes=[pltpu.VMEM((B, tile_n), jnp.float32)],
        ),
        compiler_params=pltpu.CompilerParams(
            dimension_semantics=("parallel", "arbitrary"),   # N tiles shard on v7x TCs
            vmem_limit_bytes=prep["vmem_limit_bytes"],
        ),
        cost_estimate=pl.CostEstimate(
            flops=flops, transcendentals=0, bytes_accessed=bytes_accessed),
    )(*inputs)

    if n_pad != out_features:
        out = out[:, :out_features]          # only when out_features not lane-aligned
    return out


# --------------------------------------------------------------- reference ---

def sym_linear_edge_reference(raw, x, layer_idx, in_features, out_features,
                              use_bias=True):
    hp = jax.lax.Precision.HIGHEST
    e = raw["embed"][layer_idx][None, :]
    h = jnp.tanh(jnp.dot(e, raw["W1"], precision=hp) + raw["b1"])
    weights = (jnp.dot(h, raw["Ww"], precision=hp)
               + raw["bw"]).reshape(in_features, out_features)
    out = jnp.matmul(x[:, None, :], weights, precision=hp)   # matmul(x.unsqueeze(1), W)
    if use_bias:
        bias = jnp.dot(h, raw["Wb"], precision=hp) + raw["bb"]
        out = out + bias[None, :, :]
    return out[:, 0, :]                                      # .squeeze(1)


# -------------------------------------------------------------------- main ---

if __name__ == "__main__":
    in_features = 32
    out_features = 256      # n_pad = 256 -> 2 lane-dense output tiles (megacore-friendly)
    hyper_hidden = 32
    num_layers = 4
    batch = 8
    layer_idx = 2

    key = jax.random.PRNGKey(0)
    k_params, k_x = jax.random.split(key)
    raw = init_symlinear_edge_params(
        k_params, in_features, out_features, hyper_hidden, num_layers)
    x = jax.random.normal(k_x, (batch, in_features), jnp.float32)

    ref = sym_linear_edge_reference(
        raw, x, layer_idx, in_features, out_features, use_bias=True)
    ref_nb = sym_linear_edge_reference(
        raw, x, layer_idx, in_features, out_features, use_bias=False)

    # 1) f32-stored weights, single K slab.
    prep_f32 = prepare_symlinear_edge_params(
        raw, in_features, out_features, hyper_hidden,
        use_bias=True, weight_dtype=jnp.float32)
    out_f32 = jax.block_until_ready(sym_linear_edge_forward(prep_f32, x, layer_idx))
    assert out_f32.shape == (batch, out_features)
    assert jnp.allclose(out_f32, ref, atol=2e-2, rtol=2e-2)

    # 2) default bf16-stored weights (HBM-bandwidth lever); looser tolerance for bf16.
    prep_bf16 = prepare_symlinear_edge_params(
        raw, in_features, out_features, hyper_hidden, use_bias=True)
    out_bf16 = jax.block_until_ready(sym_linear_edge_forward(prep_bf16, x, layer_idx))
    assert jnp.allclose(out_bf16, ref, atol=1e-1, rtol=5e-2)

    # 3) forced K-tiling (tiny budget) exercises the accumulator / multi-K-step path.
    prep_kt = prepare_symlinear_edge_params(
        raw, in_features, out_features, hyper_hidden, use_bias=True,
        weight_dtype=jnp.float32, weight_tile_budget_bytes=192 * 1024)
    assert prep_kt["k_tiles"] > 1 and prep_kt["n_tiles"] > 1
    out_kt = jax.block_until_ready(sym_linear_edge_forward(prep_kt, x, layer_idx))
    assert jnp.allclose(out_kt, ref, atol=2e-2, rtol=2e-2)

    # 4) bias=False path (module allows bias=None -> no add).
    prep_nb = prepare_symlinear_edge_params(
        raw, in_features, out_features, hyper_hidden, use_bias=False,
        weight_dtype=jnp.float32)
    out_nb = jax.block_until_ready(sym_linear_edge_forward(prep_nb, x, layer_idx))
    assert jnp.allclose(out_nb, ref_nb, atol=2e-2, rtol=2e-2)

    print("KERNEL_OK")
</pallas_src>

<mosaic_0001>
module attributes {stable_mosaic.version = 11 : i64} {
  func.func @kernel(%arg0: i32, %arg1: i32, %arg2: memref<8x1152xf32, #tpu.memory_space<vmem>>, %arg3: memref<1152x128xf32, #tpu.memory_space<vmem>>, %arg4: memref<1x128xf32, #tpu.memory_space<vmem>>, %arg5: memref<8x128xf32, #tpu.memory_space<vmem>>, %arg6: memref<8x128xf32, #tpu.memory_space<vmem>>) attributes {dimension_semantics = [#tpu.dimension_semantics<parallel>, #tpu.dimension_semantics<arbitrary>], iteration_bounds = array<i64: 2, 1>, scalar_prefetch = 0 : i64, scratch_operands = 1 : i64, tpu.core_type = #tpu.core_type<tc>, window_params = [{transform_indices = @transform_0, window_bounds = array<i64: 8, 1152>}, {transform_indices = @transform_1, window_bounds = array<i64: 1152, 128>}, {transform_indices = @transform_2, window_bounds = array<i64: 1, 128>}, {transform_indices = @transform_3, window_bounds = array<i64: 8, 128>}]} {
    %c0_i32 = arith.constant 0 : i32
    %0 = arith.cmpi eq, %arg1, %c0_i32 : i32
    %1 = arith.extui %0 : i1 to i32
    %c0_i32_0 = arith.constant 0 : i32
    %2 = arith.cmpi ne, %1, %c0_i32_0 : i32
    scf.if %2 {
      %cst_10 = arith.constant 0.000000e+00 : f32
      %12 = vector.broadcast %cst_10 : f32 to vector<8x128xf32>
      %c0_11 = arith.constant 0 : index
      %c0_12 = arith.constant 0 : index
      %13 = vector.load %arg6[%c0_11, %c0_12] : memref<8x128xf32, #tpu.memory_space<vmem>>, vector<8x128xf32>
      tpu.vector_store %arg6[%c0_11, %c0_12], %12 {strides = array<i32>} : memref<8x128xf32, #tpu.memory_space<vmem>>, vector<8x128xf32>,
    } else {
    }
    %c0 = arith.constant 0 : index
    %c0_1 = arith.constant 0 : index
    %3 = vector.load %arg6[%c0, %c0_1] : memref<8x128xf32, #tpu.memory_space<vmem>>, vector<8x128xf32>
    %c0_2 = arith.constant 0 : index
    %c0_3 = arith.constant 0 : index
    %4 = vector.load %arg2[%c0_2, %c0_3] : memref<8x1152xf32, #tpu.memory_space<vmem>>, vector<8x1152xf32>
    %c0_4 = arith.constant 0 : index
    %c0_5 = arith.constant 0 : index
    %5 = vector.load %arg3[%c0_4, %c0_5] : memref<1152x128xf32, #tpu.memory_space<vmem>>, vector<1152x128xf32>
    %cst = arith.constant dense<0.000000e+00> : vector<8x128xf32>
    %6 = tpu.matmul %4, %5, %cst {dimension_numbers = #tpu.dot_dimension_numbers<[1], [0], [0], [1], [0, 0, 1, 1], [], []>} : vector<8x1152xf32>, vector<1152x128xf32>, vector<8x128xf32> -> vector<8x128xf32>
    %7 = arith.addf %3, %6 : vector<8x128xf32>
    %c0_6 = arith.constant 0 : index
    %c0_7 = arith.constant 0 : index
    %8 = vector.load %arg6[%c0_6, %c0_7] : memref<8x128xf32, #tpu.memory_space<vmem>>, vector<8x128xf32>
    tpu.vector_store %arg6[%c0_6, %c0_7], %7 {strides = array<i32>} : memref<8x128xf32, #tpu.memory_space<vmem>>, vector<8x128xf32>,
    %c0_i32_8 = arith.constant 0 : i32
    %9 = arith.cmpi eq, %arg1, %c0_i32_8 : i32
    %10 = arith.extui %9 : i1 to i32
    %c0_i32_9 = arith.constant 0 : i32
    %11 = arith.cmpi ne, %10, %c0_i32_9 : i32
    scf.if %11 {
      %c0_10 = arith.constant 0 : index
      %c0_11 = arith.constant 0 : index
      %12 = vector.load %arg6[%c0_10, %c0_11] : memref<8x128xf32, #tpu.memory_space<vmem>>, vector<8x128xf32>
      %c0_12 = arith.constant 0 : index
      %c0_13 = arith.constant 0 : index
      %13 = vector.load %arg4[%c0_12, %c0_13] : memref<1x128xf32, #tpu.memory_space<vmem>>, vector<1x128xf32>
      %14 = vector.broadcast %13 : vector<1x128xf32> to vector<8x128xf32>
      %15 = arith.addf %12, %14 : vector<8x128xf32>
      %c0_14 = arith.constant 0 : index
      %c0_15 = arith.constant 0 : index
      %16 = vector.load %arg5[%c0_14, %c0_15] : memref<8x128xf32, #tpu.memory_space<vmem>>, vector<8x128xf32>
      tpu.vector_store %arg5[%c0_14, %c0_15], %15 {strides = array<i32>} : memref<8x128xf32, #tpu.memory_space<vmem>>, vector<8x128xf32>,
    } else {
    }
    return
  }
  func.func @transform_0(%arg0: i32, %arg1: i32) -> (i32, i32) {
    %c0_i32 = arith.constant 0 : i32
    %c0_i32_0 = arith.constant 0 : i32
    return %c0_i32, %arg1 : i32, i32
  }
  func.func @transform_1(%arg0: i32, %arg1: i32) -> (i32, i32) {
    %c0_i32 = arith.constant 0 : i32
    return %arg1, %arg0 : i32, i32
  }
  func.func @transform_2(%arg0: i32, %arg1: i32) -> (i32, i32) {
    %c0_i32 = arith.constant 0 : i32
    %c0_i32_0 = arith.constant 0 : i32
    return %c0_i32, %arg0 : i32, i32
  }
  func.func @transform_3(%arg0: i32, %arg1: i32) -> (i32, i32) {
    %c0_i32 = arith.constant 0 : i32
    %c0_i32_0 = arith.constant 0 : i32
    return %c0_i32, %arg0 : i32, i32
  }
}

</mosaic_0001>

<bundles_post_ra>
// kernel: tpu_custom_call.1
= control target key start
LH: loop header
LB: loop body
LE: loop exit
PB: predicated region body
PF: predicated region fallthrough
CT: control target
= control target key end

     0   :  { %s1956_s0 = inlined_call_operand.hbm [shape: f32[8,1152], index: 0, kind: input, shape index: {}]   ;;  %s1957_s1 = inlined_call_operand.hbm [shape: f32[1152,256], index: 1, kind: input, shape index: {}]   ;;  %s1958_s2 = inlined_call_operand.hbm [shape: f32[1,256], index: 2, kind: input, shape index: {}]   ;;  %s1959_s3 = inlined_call_operand.hbm [shape: f32[8,256], index: 3, kind: output, shape index: {}]  }
   0x1   :  { %1965 = sst [smem:[#allocation13_spill]] %s1957_s1 }
   0x2   :  { %8 = vsyncpa [#allocation4], 0 }
   0x3   :  { %9 = vsyncpa [#allocation7], 0 }
   0x4   :  { %11 = vsyncpa [#allocation7 + $0x1], 0 }
   0x5   :  { %12 = vsyncpa [#allocation5], 0 }
   0x6   :  { %14 = vsyncpa [#allocation5 + $0x1], 0  ;;  %s1559_s12 = smov 0   ;;  %s1561_s13 = smov 0  }
   0x7   :  { %s1563_s14 = smov 0   ;;  %s1565_s15 = smov 0  }
   0x8   :  { %s1567_s16 = smov 0   ;;  %s1569_s17 = smov 0  }
   0x9 LB: > { %s32_s18 = sadd.s32 1, %s1523_s16  ;;  %s67_s19 = sadd.s32 1, %s1515_s14  ;;  %s1527_s17 = sphi %s1569_s17, %s20_s17   ;;  %s1523_s16 = sphi %s1567_s16, %s1985_s16   ;;  %s1519_s15 = sphi %s1565_s15, %s1984_s15   ;;  %s1515_s14 = sphi %s1563_s14, %s1983_s14   ;;  %s1511_s13 = sphi %s1561_s13, %s1982_s13   ;;  %s1507_s12 = sphi %s1559_s12, %s1981_s12  }
   0xa   : > { %p34_p0 = scmp.ge.s32.totalorder %s32_s18, 2  ;;  %p74_p1 = scmp.ne.s32.totalorder %s1515_s14, %s1511_s13 }
   0xb   : > { %p75_p2 = scmp.eq.s32.totalorder %s1527_s17, 0  ;;  %p1295_p5 = scmp.lt.s32.totalorder %s1527_s17, 2 }
   0xc   : > { %s1987_s18 = smov (%p34_p0, %s32_s18), 0  ;;  %s170_s21 = sand.u32 1, %s1527_s17  }
   0xd   : > { %p76_p4 = por %p75_p2, %p74_p1  ;;  %s63_s20 = ssub.s32 %s1523_s16, %s1987_s18 }
   0xe   : > { %p65_p6 = scmp.eq.s32.totalorder %s63_s20, 0  ;;  %s172_s22 = sand.u32 1, %s1515_s14  }
   0xf   : > { %s913_s23 = sshll.u32 %s1523_s16, 7  ;;  %s1267_s25 = smul.u32 1152, %s172_s22 }
  0x10   : > { %s1607_s24 = scalar_select %p65_p6, %s1515_s14, %s67_s19  }
  0x11   : > { %s1966_s1 = sld [smem:[#allocation13_spill]]  ;;  %p1616_p7 = pnand %p1295_p5, %p76_p4 }
  0x12   : > { %s174_s30 = scalar_lea.vmem [#allocation6], %s1267_s25  ;;  %s1622_s5 = scalar_lea.sflag [#allocation7], %s170_s21 }
  0x13   : > { %s183_s4 = sshll.u32 %s174_s30, 4  ;;  %p1355_p9 = pneg %p1616_p7  ;;  %s1620_s4 = int_to_ptr.vmem [resolvable:$true] %s183_s4 }
  0x17   : > { %s1614_s28 = scalar_lea.hbm %s1966_s1, %s913_s23  ;;  %s1358_s9 = scalar_lea.hbm %s1966_s1, 36864 }
  0x18   : > { %s1353_s6 = scalar_lea.hbm %s1614_s28, 18432  ;;  %p1359_p12 = scmp.lt.u32.totalorder %s1614_s28, %s1966_s1 }
  0x19   : > { %p1354_p8 = scmp.ne.s32.totalorder %s1614_s28, %s1353_s6  ;;  %p1360_p13 = scmp.lt.u32.totalorder %s1358_s9, %s1353_s6 }
  0x1a   : > { %p1362_p2 = scmp.lt.u32.totalorder %s1353_s6, %s1614_s28 }
  0x1b   : > { %p1356_p10 = pnand %p1355_p9, %p1354_p8  ;;  %p1361_p0 = por %p1360_p13, %p1359_p12 }
  0x1d   : > { %p1357_p11 = pneg %p1356_p10  ;;  %p1363_p4 = por %p1362_p2, %p1361_p0 }
  0x1f   : > { %p1364_p5 = pnand %p1363_p4, %p1357_p11 }
  0x21   : > { %1367 = shalt.err (!%p1364_p5)
}
  0x22   : > { %s1368_s19 = scalar_lea.vmem %s1620_s4, 18432  ;;  %s1529_s20 = smov [#allocation6]  }
  0x23   : > { %p1369_p6 = scmp.ne.s32.totalorder %s1620_s4, %s1368_s19  ;;  %s1373_s21 = sshll.u32 %s1529_s20, 4  ;;  %s1374_s21 = int_to_ptr.vmem [resolvable:$false] %s1373_s21 }
  0x24   : > { %s1375_s23 = scalar_lea.vmem %s1374_s21, 36864  ;;  %p1376_p3 = scmp.lt.s32.totalorder %s1620_s4, %s1374_s21 }
  0x25   : > { %p1371_p8 = pnand %p1369_p6, %p1355_p9  ;;  %p1377_p12 = scmp.lt.s32.totalorder %s1375_s23, %s1368_s19 }
  0x27   : > { %p1372_p10 = pneg %p1371_p8  ;;  %p1378_p13 = por %p1377_p12, %p1376_p3 }
  0x29   : > { %p1379_p0 = pnand %p1378_p13, %p1372_p10 }
  0x2b   : > { %1382 = shalt.err (!%p1379_p0)
}
  0x2c   : > { %s1530_s25 = smov 256   ;;  %s1531_s26 = smov 128  }
  0x2d   : > { %s1532_s27 = smov 8   ;;  %s1651_s30 = sadd.s32 4294967295, %s1527_s17  }
  0x2e   : > { %1286 = dma.hbm_to_vmem [thread:$0]  (!%p1616_p7), %s1614_s28, 18432, %s1620_s4, %s1622_s5, %s1530_s25, %s1531_s26, %s1532_s27  }
  0x2f   : > { %s909_s6 = sadd.s32 4294967294, %s1527_s17   ;;  %p80_p3 = scmp.ne.s32.totalorder %s1511_s13, %s1507_s12 }
  0x30   : > { %p1960_p11 = scmp.eq.s32.totalorder %s1651_s30, 0  ;;  %p130_p2 = scmp.eq.s32.totalorder %s1651_s30, 1 }
  0x31   : > { %p136_p4 = scmp.eq.s32.totalorder %s909_s6, 1  ;;  %p910_p6 = scmp.ge.s32.totalorder %s1527_s17, 1 }
  0x32   : > { %p1660_p5 = por %p1960_p11, %p80_p3  ;;  %p1668_p8 = por %p130_p2, %p74_p1 }
  0x33   : > { %p1672_p10 = por %p136_p4, %p80_p3  ;;  %p143_p12 = scmp.lt.s32.totalorder %s1527_s17, 3 }
  0x34   : > { %s1968_s7 = scalar_select %p1660_p5, 1, 0 }
  0x35   : > { %s1969_s28 = scalar_select %p1668_p8, 1, 0 }
  0x36   : > { %s1970_s4 = scalar_select %p1672_p10, 1, 0 }
  0x37   : > { %p1677_p13 = pnand %p910_p6, %p143_p12  ;;  %s1533_s9 = smov [#allocation3]  }
  0x38   : > { %s159_s10 = sshll.u32 %s1533_s9, 4  ;;  %s914_s11 = sshll.u32 %s1523_s16, 4  ;;  %s1689_s10 = int_to_ptr.vmem [resolvable:$true] %s159_s10 }
  0x39   : > { %s1971_s8 = scalar_select %p1677_p13, 1, 0 }
  0x3a   : > { %p1279_p0 = pneg %p1677_p13  ;;  %s1687_s21 = scalar_lea.hbm %s1958_s2, %s914_s11 }
  0x3b   : > { %s196_s23 = scalar_lea.vmem [#allocation8], %s172_s22  ;;  %s1383_s27 = scalar_lea.hbm %s1687_s21, 16 }
  0x3c   : > { %s203_s25 = sshll.u32 %s196_s23, 4  ;;  %p1695_p1 = pnand %p1279_p0, %p1960_p11  ;;  %s204_s25 = int_to_ptr.vmem [resolvable:$true] %s203_s25 }
  0x3d   : > { %p1384_p3 = scmp.ne.s32.totalorder %s1687_s21, %s1383_s27  ;;  %s1388_s11 = scalar_lea.hbm %s1958_s2, 32 }
  0x3e   : > { %s1972_s26 = scalar_select %p1695_p1, 1, 0 }
  0x3f   : > { %p1386_p2 = pnand %p1384_p3, %p1355_p9  ;;  %p1389_p6 = scmp.lt.u32.totalorder %s1687_s21, %s1958_s2 }
  0x40   : > { %p1390_p12 = scmp.lt.u32.totalorder %s1388_s11, %s1383_s27  ;;  %p1392_p11 = scmp.lt.u32.totalorder %s1383_s27, %s1687_s21 }
  0x41   : > { %p1387_p4 = pneg %p1386_p2 }
  0x42   : > { %p1391_p0 = por %p1390_p12, %p1389_p6 }
  0x44   : > { %p1393_p10 = por %p1392_p11, %p1391_p0 }
  0x46   : > { %p1394_p8 = pnand %p1393_p10, %p1387_p4 }
  0x48   : > { %1397 = shalt.err (!%p1394_p8)
}
  0x49   : > { %s1398_s22 = scalar_lea.vmem %s204_s25, 16  ;;  %s1534_s23 = smov [#allocation8]  }
  0x4a   : > { %p1399_p5 = scmp.ne.s32.totalorder %s204_s25, %s1398_s22  ;;  %s1403_s6 = sshll.u32 %s1534_s23, 4  ;;  %s1404_s6 = int_to_ptr.vmem [resolvable:$false] %s1403_s6 }
  0x4b   : > { %s1405_s9 = scalar_lea.vmem %s1404_s6, 32  ;;  %p1406_p13 = scmp.lt.s32.totalorder %s204_s25, %s1404_s6 }
  0x4c   : > { %p1401_p3 = pnand %p1399_p5, %p1355_p9  ;;  %p1407_p1 = scmp.lt.s32.totalorder %s1405_s9, %s1398_s22 }
  0x4e   : > { %p1402_p2 = pneg %p1401_p3  ;;  %p1408_p6 = por %p1407_p1, %p1406_p13 }
  0x50   : > { %p1409_p12 = pnand %p1408_p6, %p1402_p2 }
  0x52   : > { %1412 = shalt.err (!%p1409_p12)
}
  0x53   : > { %1289 = dma.hbm_to_vmem [thread:$0]  (!%p1616_p7), %s1687_s21, 16, %s204_s25, %s1622_s5  }
  0x54   : > { %s1413_s19 = scalar_lea.hbm %s1956_s0, 1152  ;;  %p1973_p11 = scmp.ne.s32.totalorder %s1972_s26, 0 }
  0x55   : > { %p1414_p9 = scmp.ne.s32.totalorder %s1956_s0, %s1413_s19  ;;  %p1420_p13 = scmp.lt.u32.totalorder %s1413_s19, %s1956_s0 }
  0x56   : > { %p1415_p5 = pneg %p1973_p11 }
  0x58   : > { %p1416_p8 = pnand %p1415_p5, %p1414_p9 }
  0x5a   : > { %p1417_p10 = pneg %p1416_p8 }
  0x5c   : > { %p1422_p1 = pnand %p1420_p13, %p1417_p10 }
  0x5e   : > { %1425 = shalt.err (!%p1422_p1)
}
  0x5f   : > { %s1426_s29 = scalar_lea.vmem %s1689_s10, 1152  ;;  %p1434_p3 = scmp.lt.s32.totalorder %s1689_s10, %s1689_s10 }
  0x60   : > { %p1427_p7 = scmp.ne.s32.totalorder %s1689_s10, %s1426_s29  ;;  %p1435_p2 = scmp.lt.s32.totalorder %s1426_s29, %s1426_s29 }
  0x62   : > { %p1429_p4 = pnand %p1427_p7, %p1415_p5  ;;  %p1436_p6 = por %p1435_p2, %p1434_p3 }
  0x64   : > { %p1430_p0 = pneg %p1429_p4 }
  0x66   : > { %p1437_p12 = pnand %p1436_p6, %p1430_p0 }
  0x68   : > { %1440 = shalt.err (!%p1437_p12)
}
  0x69   : > { %1282 = dma.hbm_to_vmem [thread:$0]  (!%p1973_p11), %s1956_s0, 1152, %s1689_s10, [#allocation4]  }
  0x6a   : > { %p1974_p9 = scmp.ne.s32.totalorder %s1971_s8, 0 }
  0x6b   : > { %p1975_p8 = scmp.eq.s32.totalorder (!%p1974_p9), %s1651_s30, 0 }
  0x6c   : > { %212 = sbr.rel (%p1974_p9) target bundleno = 451 (0x1c3), region = 32 }
  0x73   : > { %1494 = dma.done.wait (%p1975_p8), [#allocation4], 1152   ;;  %p1976_p5 = pmov %p1975_p8 }
  0x74   : > { %s218_s21 = sand.u32 1, %s1651_s30   ;;  %s1748_s25 = sand.u32 1, %s1511_s13  }
  0x75   : > { %1496 = vsyncadd (%p1976_p5), [#allocation4], 4294966144  ;;  %s1268_s26 = smul.u32 1152, %s1748_s25  ;;  %s219_s6 = scalar_lea.sflag [#allocation7], %s218_s21 }
  0x76   : > { %p1977_p11 = scmp.ne.s32.totalorder %s1968_s7, 0 }
  0x77   : > { %s1751_s9 = scalar_lea.vmem [#allocation6], %s1268_s26 }
  0x78   : > { %1498 = dma.done.wait (%p1977_p11), %s219_s6, 18448  }
  0x79   : > { %1500 = vsyncadd (%p1977_p11), %s219_s6, 4294948848  ;;  %v290_v0 = vld [vmem:[%s1751_s9 + $0x80] sm:$0xff]  ;;  %v291_v1 = vld [vmem:[%s1751_s9 + $0x88] sm:$0xff]  ;;  %vm1536_vm0 = vmmov 0   ;;  %s917_s30 = sshll.u32 %s1748_s25, 3  ;;  %s230_s7 = scalar_lea.vmem [#allocation8], %s1748_s25 }
  0x7a   : > { %v322_v2 = vld [vmem:[%s1751_s9 + $0x180] sm:$0xff]  ;;  %v1115_v3 = vpack.c.bf16 %v291_v1, %v290_v0  ;;  %v323_v4 = vld [vmem:[%s1751_s9 + $0x188] sm:$0xff]  ;;  %v292_v11 = vld [vmem:[%s1751_s9 + $0x90] sm:$0xff]  ;;  %s920_s8 = sshll.u32 %s1519_s15, 7  ;;  %s256_s10 = scalar_lea.vmem [#allocation9], %s917_s30 }
  0x7b   : > { %v274_v5 = vld [vmem:[%s1751_s9] sm:$0xff]  ;;  %v275_v6 = vld [vmem:[%s1751_s9 + $0x8] sm:$0xff]  ;;  %v1147_v7 = vpack.c.bf16 %v323_v4, %v322_v2  ;;  %v293_v13 = vld [vmem:[%s1751_s9 + $0x98] sm:$0xff]  ;;  %s797_s27 = sshll.u32 %s256_s10, 4  ;;  %s1907_s20 = scalar_lea.hbm %s1959_s3, %s920_s8  ;;  %s1909_s27 = int_to_ptr.vmem [resolvable:$true] %s797_s27 }
  0x7c   : > { %v1117_v8 = vpack.c.bf16 %v275_v6, %v274_v5  ;;  %v306_v9 = vld [vmem:[%s1751_s9 + $0x100] sm:$0xff]  ;;  %v307_v10 = vld [vmem:[%s1751_s9 + $0x108] sm:$0xff]  ;;  %1116 = vmatprep.subr.bf16.mxu0 %v1115_v3  ;;  %v324_v14 = vld [vmem:[%s1751_s9 + $0x190] sm:$0xff]  ;;  %v1119_v16 = vpack.c.bf16 %v293_v13, %v292_v11  ;;  %s784_s22 = scalar_lea.sflag [#allocation5], %s1748_s25  ;;  %s1441_s23 = scalar_lea.vmem %s1909_s27, 128 }
  0x7d   : > { %v1149_v12 = vpack.c.bf16 %v307_v10, %v306_v9  ;;  %v325_v15 = vld [vmem:[%s1751_s9 + $0x198] sm:$0xff]  ;;  %1148 = vmatprep.subr.bf16.mxu1 %v1147_v7  ;;  %v276_v18 = vld [vmem:[%s1751_s9 + $0x10] sm:$0xff]  ;;  %v294_v23 = vld [vmem:[%s1751_s9 + $0xa0] sm:$0xff]  ;;  %p1442_p10 = scmp.ne.s32.totalorder %s1909_s27, %s1441_s23  ;;  %p1978_p13 = scmp.ne.s32.totalorder %s1969_s28, 0 }
  0x7e   : > { %1118 = vmatpush3.bf16.msra.mxu0 %v1117_v8  ;;  %v1151_v17 = vpack.c.bf16 %v325_v15, %v324_v14  ;;  %v277_v19 = vld [vmem:[%s1751_s9 + $0x18] sm:$0xff]  ;;  %v308_v20 = vld [vmem:[%s1751_s9 + $0x110] sm:$0xff]  ;;  %v295_v24 = vld [vmem:[%s1751_s9 + $0xa8] sm:$0xff]  ;;  %s1538_s15 = smov [#allocation9]  }
  0x7f   : > { %1150 = vmatpush3.bf16.msra.mxu1 %v1149_v12  ;;  %v1121_v21 = vpack.c.bf16 %v277_v19, %v276_v18  ;;  %v309_v22 = vld [vmem:[%s1751_s9 + $0x118] sm:$0xff]  ;;  %1120 = vmatprep.subr.bf16.mxu0 %v1119_v16  ;;  %v1123_v26 = vpack.c.bf16 %v295_v24, %v294_v23  ;;  %v326_v27 = vld [vmem:[%s1751_s9 + $0x1a0] sm:$0xff]  ;;  %v327_v28 = vld [vmem:[%s1751_s9 + $0x1a8] sm:$0xff]  ;;  %p1443_p1 = pnand %p1442_p10, %p1978_p13  ;;  %s1445_s29 = sshll.u32 %s1538_s15, 4  ;;  %s1446_s29 = int_to_ptr.vmem [resolvable:$false] %s1445_s29 }
  0x80   : > { %1152 = vmatprep.subr.bf16.mxu1 %v1151_v17  ;;  %v1153_v25 = vpack.c.bf16 %v309_v22, %v308_v20  ;;  %v278_v29 = vld [vmem:[%s1751_s9 + $0x20] sm:$0xff]  ;;  %v1155_v30 = vpack.c.bf16 %v327_v28, %v326_v27  ;;  %v279_v31 = vld [vmem:[%s1751_s9 + $0x28] sm:$0xff]  ;;  %v296_v35 = vld [vmem:[%s1751_s9 + $0xb0] sm:$0xff]  ;;  %s1447_s1 = scalar_lea.vmem %s1446_s29, 256  ;;  %p1448_p4 = scmp.lt.s32.totalorder %s1909_s27, %s1446_s29 }
  0x81   : > { %v310_v32 = vld [vmem:[%s1751_s9 + $0x120] sm:$0xff]  ;;  %v311_v33 = vld [vmem:[%s1751_s9 + $0x128] sm:$0xff]  ;;  %v1125_v34 = vpack.c.bf16 %v279_v31, %v278_v29  ;;  %v297_v36 = vld [vmem:[%s1751_s9 + $0xb8] sm:$0xff]  ;;  %p1444_p7 = pneg %p1443_p1  ;;  %p1449_p0 = scmp.lt.s32.totalorder %s1447_s1, %s1441_s23 }
  0x82   : > { %1122 = vmatpush3.bf16.msra.mxu0 %v1121_v21  ;;  %v328_v37 = vld [vmem:[%s1751_s9 + $0x1b0] sm:$0xff]  ;;  %v1157_v38 = vpack.c.bf16 %v311_v33, %v310_v32  ;;  %v1127_v39 = vpack.c.bf16 %v297_v36, %v296_v35  ;;  %v329_v40 = vld [vmem:[%s1751_s9 + $0x1b8] sm:$0xff]  ;;  %v298_v46 = vld [vmem:[%s1751_s9 + $0xc0] sm:$0xff] }
  0x83   : > { %1154 = vmatpush3.bf16.msra.mxu1 %v1153_v25  ;;  %1124 = vmatprep.subr.bf16.mxu0 %v1123_v26  ;;  %v280_v41 = vld [vmem:[%s1751_s9 + $0x30] sm:$0xff]  ;;  %v281_v42 = vld [vmem:[%s1751_s9 + $0x38] sm:$0xff]  ;;  %v1159_v43 = vpack.c.bf16 %v329_v40, %v328_v37  ;;  %v299_v47 = vld [vmem:[%s1751_s9 + $0xc8] sm:$0xff]  ;;  %p1450_p3 = por %p1449_p0, %p1448_p4 }
  0x84   : > { %1156 = vmatprep.subr.bf16.mxu1 %v1155_v30  ;;  %v312_v44 = vld [vmem:[%s1751_s9 + $0x130] sm:$0xff]  ;;  %v313_v45 = vld [vmem:[%s1751_s9 + $0x138] sm:$0xff]  ;;  %v330_v48 = vld [vmem:[%s1751_s9 + $0x1c0] sm:$0xff]  ;;  %v1129_v50 = vpack.c.bf16 %v281_v42, %v280_v41  ;;  %v1131_v52 = vpack.c.bf16 %v299_v47, %v298_v46 }
  0x85   : > { %v331_v49 = vld [vmem:[%s1751_s9 + $0x1c8] sm:$0xff]  ;;  %v1161_v51 = vpack.c.bf16 %v313_v45, %v312_v44  ;;  %v282_v53 = vld [vmem:[%s1751_s9 + $0x40] sm:$0xff]  ;;  %v300_v58 = vld [vmem:[%s1751_s9 + $0xd0] sm:$0xff]  ;;  %p1451_p2 = pnand %p1450_p3, %p1444_p7 }
  0x86   : > { %1126 = vmatpush3.bf16.msra.mxu0 %v1125_v34  ;;  %v283_v54 = vld [vmem:[%s1751_s9 + $0x48] sm:$0xff]  ;;  %v314_v55 = vld [vmem:[%s1751_s9 + $0x140] sm:$0xff]  ;;  %v1163_v56 = vpack.c.bf16 %v331_v49, %v330_v48  ;;  %v301_v59 = vld [vmem:[%s1751_s9 + $0xd8] sm:$0xff] }
  0x87   : > { %1158 = vmatpush3.bf16.msra.mxu1 %v1157_v38  ;;  %1128 = vmatprep.subr.bf16.mxu0 %v1127_v39  ;;  %v315_v57 = vld [vmem:[%s1751_s9 + $0x148] sm:$0xff]  ;;  %v332_v60 = vld [vmem:[%s1751_s9 + $0x1d0] sm:$0xff]  ;;  %v333_v61 = vld [vmem:[%s1751_s9 + $0x1d8] sm:$0xff]  ;;  %v1133_v62 = vpack.c.bf16 %v283_v54, %v282_v53  ;;  %v1135_v0 = vpack.c.bf16 %v301_v59, %v300_v58 }
  0x88   : > { %1160 = vmatprep.subr.bf16.mxu1 %v1159_v43  ;;  %v1165_v63 = vpack.c.bf16 %v315_v57, %v314_v55  ;;  %v284_v1 = vld [vmem:[%s1751_s9 + $0x50] sm:$0xff]  ;;  %v285_v2 = vld [vmem:[%s1751_s9 + $0x58] sm:$0xff]  ;;  %v1167_v4 = vpack.c.bf16 %v333_v61, %v332_v60  ;;  %v302_v6 = vld [vmem:[%s1751_s9 + $0xe0] sm:$0xff] }
  0x89   : > { %v316_v3 = vld [vmem:[%s1751_s9 + $0x150] sm:$0xff]  ;;  %v317_v5 = vld [vmem:[%s1751_s9 + $0x158] sm:$0xff]  ;;  %v303_v7 = vld [vmem:[%s1751_s9 + $0xe8] sm:$0xff]  ;;  %v1137_v10 = vpack.c.bf16 %v285_v2, %v284_v1 }
  0x8a   : > { %1130 = vmatpush3.bf16.msra.mxu0 %v1129_v50  ;;  %v334_v8 = vld [vmem:[%s1751_s9 + $0x1e0] sm:$0xff]  ;;  %v335_v9 = vld [vmem:[%s1751_s9 + $0x1e8] sm:$0xff]  ;;  %v1169_v13 = vpack.c.bf16 %v317_v5, %v316_v3  ;;  %v1139_v14 = vpack.c.bf16 %v303_v7, %v302_v6  ;;  %v268_v17 = vld [vmem:[#allocation3 + $0x18] sm:$0xff] }
  0x8b   : > { %1162 = vmatpush3.bf16.msra.mxu1 %v1161_v51  ;;  %1132 = vmatprep.subr.bf16.mxu0 %v1131_v52  ;;  %v286_v11 = vld [vmem:[%s1751_s9 + $0x60] sm:$0xff]  ;;  %v287_v12 = vld [vmem:[%s1751_s9 + $0x68] sm:$0xff]  ;;  %v1171_v18 = vpack.c.bf16 %v335_v9, %v334_v8  ;;  %v304_v20 = vld [vmem:[%s1751_s9 + $0xf0] sm:$0xff] }
  0x8c   : > { %1164 = vmatprep.subr.bf16.mxu1 %v1163_v56  ;;  %v318_v15 = vld [vmem:[%s1751_s9 + $0x160] sm:$0xff]  ;;  %v319_v19 = vld [vmem:[%s1751_s9 + $0x168] sm:$0xff]  ;;  %v305_v21 = vld [vmem:[%s1751_s9 + $0xf8] sm:$0xff]  ;;  %552 = vmatprep.mubr.f32.mxu1 %v268_v17  ;;  %v1141_v24 = vpack.c.bf16 %v287_v12, %v286_v11 }
  0x8d   : > { %v266_v16 = vld [vmem:[#allocation3 + $0x8] sm:$0xff]  ;;  %v336_v22 = vld [vmem:[%s1751_s9 + $0x1f0] sm:$0xff]  ;;  %v337_v23 = vld [vmem:[%s1751_s9 + $0x1f8] sm:$0xff]  ;;  %v1173_v25 = vpack.c.bf16 %v319_v19, %v318_v15  ;;  %v1143_v26 = vpack.c.bf16 %v305_v21, %v304_v20 }
  0x8e   : > { %1134 = vmatpush3.bf16.msra.mxu0 %v1133_v62  ;;  %482 = vmatprep.mubr.f32.mxu0 %v266_v16  ;;  %v288_v27 = vld [vmem:[%s1751_s9 + $0x70] sm:$0xff]  ;;  %v289_v28 = vld [vmem:[%s1751_s9 + $0x78] sm:$0xff]  ;;  %v1175_v30 = vpack.c.bf16 %v337_v23, %v336_v22  ;;  %v354_v32 = vld [vmem:[%s1751_s9 + $0x280] sm:$0xff] }
  0x8f   : > { %1166 = vmatpush3.bf16.msra.mxu1 %v1165_v63  ;;  %1136 = vmatprep.subr.bf16.mxu0 %v1135_v0  ;;  %v320_v29 = vld [vmem:[%s1751_s9 + $0x170] sm:$0xff]  ;;  %v321_v31 = vld [vmem:[%s1751_s9 + $0x178] sm:$0xff]  ;;  %v355_v33 = vld [vmem:[%s1751_s9 + $0x288] sm:$0xff]  ;;  %v1145_v36 = vpack.c.bf16 %v289_v28, %v288_v27 }
  0x90   : > { %1168 = vmatprep.subr.bf16.mxu1 %v1167_v4  ;;  %v386_v34 = vld [vmem:[%s1751_s9 + $0x380] sm:$0xff]  ;;  %v387_v35 = vld [vmem:[%s1751_s9 + $0x388] sm:$0xff]  ;;  %v1177_v37 = vpack.c.bf16 %v321_v31, %v320_v29  ;;  %v1179_v38 = vpack.c.bf16 %v355_v33, %v354_v32  ;;  %v356_v44 = vld [vmem:[%s1751_s9 + $0x290] sm:$0xff] }
  0x91   : > { %v338_v39 = vld [vmem:[%s1751_s9 + $0x200] sm:$0xff]  ;;  %v339_v40 = vld [vmem:[%s1751_s9 + $0x208] sm:$0xff]  ;;  %v1211_v42 = vpack.c.bf16 %v387_v35, %v386_v34  ;;  %v357_v45 = vld [vmem:[%s1751_s9 + $0x298] sm:$0xff] }
  0x92   : > { %1138 = vmatpush3.bf16.msra.mxu0 %v1137_v10  ;;  %v370_v41 = vld [vmem:[%s1751_s9 + $0x300] sm:$0xff]  ;;  %v371_v43 = vld [vmem:[%s1751_s9 + $0x308] sm:$0xff]  ;;  %v388_v46 = vld [vmem:[%s1751_s9 + $0x390] sm:$0xff]  ;;  %v1181_v50 = vpack.c.bf16 %v339_v40, %v338_v39  ;;  %v1183_v52 = vpack.c.bf16 %v357_v45, %v356_v44 }
  0x93   : > { %1170 = vmatpush3.bf16.msra.mxu1 %v1169_v13  ;;  %1140 = vmatprep.subr.bf16.mxu0 %v1139_v14  ;;  %v389_v47 = vld [vmem:[%s1751_s9 + $0x398] sm:$0xff]  ;;  %v267_v49 = vld [vmem:[#allocation3 + $0x10] sm:$0xff]  ;;  %v1213_v51 = vpack.c.bf16 %v371_v43, %v370_v41  ;;  %v340_v53 = vld [vmem:[%s1751_s9 + $0x210] sm:$0xff] }
  0x94   : > { %1172 = vmatprep.subr.bf16.mxu1 %v1171_v18  ;;  %v265_v48 = vld [vmem:[#allocation3] sm:$0xff]  ;;  %v372_v55 = vld [vmem:[%s1751_s9 + $0x310] sm:$0xff]  ;;  %v1215_v56 = vpack.c.bf16 %v389_v47, %v388_v46  ;;  %v358_v58 = vld [vmem:[%s1751_s9 + $0x2a0] sm:$0xff] }
  0x95   : > { %v341_v54 = vld [vmem:[%s1751_s9 + $0x218] sm:$0xff]  ;;  %v359_v59 = vld [vmem:[%s1751_s9 + $0x2a8] sm:$0xff]  ;;  %v390_v60 = vld [vmem:[%s1751_s9 + $0x3a0] sm:$0xff] }
  0x96   : > { %1142 = vmatpush3.bf16.msra.mxu0 %v1141_v24  ;;  %v373_v57 = vld [vmem:[%s1751_s9 + $0x318] sm:$0xff]  ;;  %v391_v61 = vld [vmem:[%s1751_s9 + $0x3a8] sm:$0xff]  ;;  %v1185_v62 = vpack.c.bf16 %v341_v54, %v340_v53  ;;  %v1187_v0 = vpack.c.bf16 %v359_v59, %v358_v58  ;;  %v342_v1 = vld [vmem:[%s1751_s9 + $0x220] sm:$0xff] }
  0x97   : > { %1174 = vmatpush3.bf16.msra.mxu1 %v1173_v25  ;;  %1144 = vmatprep.subr.bf16.mxu0 %v1143_v26  ;;  %v1217_v63 = vpack.c.bf16 %v373_v57, %v372_v55  ;;  %v343_v2 = vld [vmem:[%s1751_s9 + $0x228] sm:$0xff]  ;;  %v374_v3 = vld [vmem:[%s1751_s9 + $0x320] sm:$0xff]  ;;  %v1219_v4 = vpack.c.bf16 %v391_v61, %v390_v60  ;;  %v360_v6 = vld [vmem:[%s1751_s9 + $0x2b0] sm:$0xff] }
  0x98   : > { %1176 = vmatprep.subr.bf16.mxu1 %v1175_v30  ;;  %v375_v5 = vld [vmem:[%s1751_s9 + $0x328] sm:$0xff]  ;;  %v361_v7 = vld [vmem:[%s1751_s9 + $0x2b8] sm:$0xff]  ;;  %v392_v8 = vld [vmem:[%s1751_s9 + $0x3b0] sm:$0xff]  ;;  %v1189_v10 = vpack.c.bf16 %v343_v2, %v342_v1 }
  0x99   : > { %v393_v9 = vld [vmem:[%s1751_s9 + $0x3b8] sm:$0xff]  ;;  %v1221_v11 = vpack.c.bf16 %v375_v5, %v374_v3  ;;  %v1191_v12 = vpack.c.bf16 %v361_v7, %v360_v6  ;;  %v344_v13 = vld [vmem:[%s1751_s9 + $0x230] sm:$0xff]  ;;  %v362_v18 = vld [vmem:[%s1751_s9 + $0x2c0] sm:$0xff] }
  0x9a   : > { %1146 = vmatpush3.bf16.msra.mxu0 %v1145_v36  ;;  %v345_v14 = vld [vmem:[%s1751_s9 + $0x238] sm:$0xff]  ;;  %v376_v15 = vld [vmem:[%s1751_s9 + $0x330] sm:$0xff]  ;;  %v1223_v16 = vpack.c.bf16 %v393_v9, %v392_v8  ;;  %v363_v19 = vld [vmem:[%s1751_s9 + $0x2c8] sm:$0xff] }
  0x9b   : > { %1178 = vmatpush3.bf16.msra.mxu1 %v1177_v37  ;;  %1180 = vmatprep.subr.bf16.mxu0 %v1179_v38  ;;  %v377_v17 = vld [vmem:[%s1751_s9 + $0x338] sm:$0xff]  ;;  %v394_v20 = vld [vmem:[%s1751_s9 + $0x3c0] sm:$0xff]  ;;  %v395_v21 = vld [vmem:[%s1751_s9 + $0x3c8] sm:$0xff]  ;;  %v1193_v23 = vpack.c.bf16 %v345_v14, %v344_v13  ;;  %v1195_v26 = vpack.c.bf16 %v363_v19, %v362_v18 }
  0x9c   : > { %1212 = vmatprep.subr.bf16.mxu1 %v1211_v42  ;;  %v270_v22 = vld [vmem:[#allocation3 + $0x28] sm:$0xff]  ;;  %v272_v24 = vld [vmem:[#allocation3 + $0x38] sm:$0xff]  ;;  %v1225_v25 = vpack.c.bf16 %v377_v17, %v376_v15  ;;  %v347_v28 = vld [vmem:[%s1751_s9 + $0x248] sm:$0xff]  ;;  %v1227_v30 = vpack.c.bf16 %v395_v21, %v394_v20  ;;  %v1537_v17 = vmov 0.0  }
  0x9d   : > { %483 = vmatmul.mubr.f32.vlgmr.msra.gmra.mrb[0].mxu0 %v265_v48  ;;  %v346_v27 = vld [vmem:[%s1751_s9 + $0x240] sm:$0xff]  ;;  %v379_v31 = vld [vmem:[%s1751_s9 + $0x348] sm:$0xff]  ;;  %v364_v32 = vld [vmem:[%s1751_s9 + $0x2d0] sm:$0xff] }
  0x9e   : > { %553 = vmatmul.mubr.f32.vlgmr.msra.gmra.mrb[0].mxu1 %v267_v49  ;;  %1182 = vmatpush3.bf16.msra.mxu0 %v1181_v50  ;;  %v378_v29 = vld [vmem:[%s1751_s9 + $0x340] sm:$0xff]  ;;  %v365_v33 = vld [vmem:[%s1751_s9 + $0x2d8] sm:$0xff]  ;;  %v396_v34 = vld [vmem:[%s1751_s9 + $0x3d0] sm:$0xff]  ;;  %v1197_v36 = vpack.c.bf16 %v347_v28, %v346_v27 }
  0x9f   : > { %1214 = vmatpush3.bf16.msra.mxu1 %v1213_v51  ;;  %1184 = vmatprep.subr.bf16.mxu0 %v1183_v52  ;;  %v397_v35 = vld [vmem:[%s1751_s9 + $0x3d8] sm:$0xff]  ;;  %v1229_v37 = vpack.c.bf16 %v379_v31, %v378_v29  ;;  %v1199_v38 = vpack.c.bf16 %v365_v33, %v364_v32  ;;  %v348_v39 = vld [vmem:[%s1751_s9 + $0x250] sm:$0xff]  ;;  %v366_v44 = vld [vmem:[%s1751_s9 + $0x2e0] sm:$0xff] }
  0xa0   : > { %1216 = vmatprep.subr.bf16.mxu1 %v1215_v56  ;;  %622 = vmatprep.mubr.f32.mxu0 %v270_v22  ;;  %v349_v40 = vld [vmem:[%s1751_s9 + $0x258] sm:$0xff]  ;;  %v380_v41 = vld [vmem:[%s1751_s9 + $0x350] sm:$0xff]  ;;  %v1231_v42 = vpack.c.bf16 %v397_v35, %v396_v34  ;;  %v367_v45 = vld [vmem:[%s1751_s9 + $0x2e8] sm:$0xff] }
  0xa1   : > { %692 = vmatprep.mubr.f32.mxu1 %v272_v24  ;;  %v381_v43 = vld [vmem:[%s1751_s9 + $0x358] sm:$0xff]  ;;  %v398_v46 = vld [vmem:[%s1751_s9 + $0x3e0] sm:$0xff]  ;;  %v399_v47 = vld [vmem:[%s1751_s9 + $0x3e8] sm:$0xff]  ;;  %v1201_v48 = vpack.c.bf16 %v349_v40, %v348_v39  ;;  %v1203_v50 = vpack.c.bf16 %v367_v45, %v366_v44 }
  0xa2   : > { %1186 = vmatpush3.bf16.msra.mxu0 %v1185_v62  ;;  %v1233_v49 = vpack.c.bf16 %v381_v43, %v380_v41  ;;  %v350_v51 = vld [vmem:[%s1751_s9 + $0x260] sm:$0xff]  ;;  %v351_v52 = vld [vmem:[%s1751_s9 + $0x268] sm:$0xff]  ;;  %v1235_v54 = vpack.c.bf16 %v399_v47, %v398_v46  ;;  %v368_v56 = vld [vmem:[%s1751_s9 + $0x2f0] sm:$0xff] }
  0xa3   : > { %1218 = vmatpush3.bf16.msra.mxu1 %v1217_v63  ;;  %1188 = vmatprep.subr.bf16.mxu0 %v1187_v0  ;;  %v382_v53 = vld [vmem:[%s1751_s9 + $0x360] sm:$0xff]  ;;  %v383_v55 = vld [vmem:[%s1751_s9 + $0x368] sm:$0xff]  ;;  %v369_v57 = vld [vmem:[%s1751_s9 + $0x2f8] sm:$0xff]  ;;  %v1205_v60 = vpack.c.bf16 %v351_v52, %v350_v51 }
  0xa4   : > { %1220 = vmatprep.subr.bf16.mxu1 %v1219_v4  ;;  %v400_v58 = vld [vmem:[%s1751_s9 + $0x3f0] sm:$0xff]  ;;  %v401_v59 = vld [vmem:[%s1751_s9 + $0x3f8] sm:$0xff]  ;;  %v1237_v61 = vpack.c.bf16 %v383_v55, %v382_v53  ;;  %v1207_v62 = vpack.c.bf16 %v369_v57, %v368_v56  ;;  %v402_v6 = vld [vmem:[%s1751_s9 + $0x400] sm:$0xff] }
  0xa5   : > { %v352_v63 = vld [vmem:[%s1751_s9 + $0x270] sm:$0xff]  ;;  %v353_v0 = vld [vmem:[%s1751_s9 + $0x278] sm:$0xff]  ;;  %v1239_v1 = vpack.c.bf16 %v401_v59, %v400_v58  ;;  %v403_v7 = vld [vmem:[%s1751_s9 + $0x408] sm:$0xff] }
  0xa6   : > { %1190 = vmatpush3.bf16.msra.mxu0 %v1189_v10  ;;  %v384_v2 = vld [vmem:[%s1751_s9 + $0x370] sm:$0xff]  ;;  %v385_v3 = vld [vmem:[%s1751_s9 + $0x378] sm:$0xff]  ;;  %v1209_v4 = vpack.c.bf16 %v353_v0, %v352_v63  ;;  %v1244_v9 = vpack.c.bf16 %v403_v7, %v402_v6  ;;  %v1535_v10 = vmov 0.0|0.0   ;;  %v406_v15 = vld [vmem:[%s1751_s9 + $0x420] sm:$0xff] }
  0xa7   : > { %1222 = vmatpush3.bf16.msra.mxu1 %v1221_v11  ;;  %1192 = vmatprep.subr.bf16.mxu0 %v1191_v12  ;;  %v1241_v5 = vpack.c.bf16 %v385_v3, %v384_v2  ;;  %v269_v8 = vld [vmem:[#allocation3 + $0x20] sm:$0xff]  ;;  %v271_v11 = vld [vmem:[#allocation3 + $0x30] sm:$0xff]  ;;  %v404_v12 = vld [vmem:[%s1751_s9 + $0x410] sm:$0xff] }
  0xa8   : > { %1224 = vmatprep.subr.bf16.mxu1 %v1223_v16  ;;  %v405_v13 = vld [vmem:[%s1751_s9 + $0x418] sm:$0xff]  ;;  %v407_v16 = vld [vmem:[%s1751_s9 + $0x428] sm:$0xff]  ;;  %v408_v19 = vld [vmem:[%s1751_s9 + $0x430] sm:$0xff] }
  0xa9   : > { %v1247_v14 = vpack.c.bf16 %v405_v13, %v404_v12  ;;  %v1250_v18 = vpack.c.bf16 %v407_v16, %v406_v15  ;;  %v409_v20 = vld [vmem:[%s1751_s9 + $0x438] sm:$0xff]  ;;  %v410_v22 = vld [vmem:[%s1751_s9 + $0x440] sm:$0xff]  ;;  %v415_v29 = vld [vmem:[%s1751_s9 + $0x468] sm:$0xff] }
  0xaa   : > { %1194 = vmatpush3.bf16.msra.mxu0 %v1193_v23  ;;  %v1253_v21 = vpack.c.bf16 %v409_v20, %v408_v19  ;;  %v411_v23 = vld [vmem:[%s1751_s9 + $0x448] sm:$0xff]  ;;  %v414_v28 = vld [vmem:[%s1751_s9 + $0x460] sm:$0xff]  ;;  %v416_v31 = vld [vmem:[%s1751_s9 + $0x470] sm:$0xff] }
  0xab   : > { %1226 = vmatpush3.bf16.msra.mxu1 %v1225_v25  ;;  %1196 = vmatprep.subr.bf16.mxu0 %v1195_v26  ;;  %v1256_v24 = vpack.c.bf16 %v411_v23, %v410_v22  ;;  %v412_v25 = vld [vmem:[%s1751_s9 + $0x450] sm:$0xff]  ;;  %v413_v26 = vld [vmem:[%s1751_s9 + $0x458] sm:$0xff] }
  0xac   : > { %1228 = vmatprep.subr.bf16.mxu1 %v1227_v30  ;;  %v1259_v27 = vpack.c.bf16 %v413_v26, %v412_v25  ;;  %v1262_v30 = vpack.c.bf16 %v415_v29, %v414_v28  ;;  %v417_v32 = vld [vmem:[%s1751_s9 + $0x478] sm:$0xff] }
  0xad   : > { %v1265_v33 = vpack.c.bf16 %v417_v32, %v416_v31  ;;  %v273_v34 = vld [vmem:[#allocation3 + $0x40] sm:$0xff] }
  0xae   : > { %1198 = vmatpush3.bf16.msra.mxu0 %v1197_v36  ;;  %v918_v51 = vld [vmem:[%s230_s7] ss:$0 sm:$0xff] }
  0xaf   : > { %1230 = vmatpush3.bf16.msra.mxu1 %v1229_v37  ;;  %1200 = vmatprep.subr.bf16.mxu0 %v1199_v38 }
  0xb0   : > { %1232 = vmatprep.subr.bf16.mxu1 %v1231_v42 }
  0xb2   : > { %1202 = vmatpush3.bf16.msra.mxu0 %v1201_v48 }
  0xb3   : > { %1234 = vmatpush3.bf16.msra.mxu1 %v1233_v49  ;;  %1204 = vmatprep.subr.bf16.mxu0 %v1203_v50 }
  0xb4   : > { %1236 = vmatprep.subr.bf16.mxu1 %v1235_v54 }
  0xb6   : > { %1206 = vmatpush3.bf16.msra.mxu0 %v1205_v60 }
  0xb7   : > { %1238 = vmatpush3.bf16.msra.mxu1 %v1237_v61  ;;  %1208 = vmatprep.subr.bf16.mxu0 %v1207_v62 }
  0xb8   : > { %1240 = vmatprep.subr.bf16.mxu1 %v1239_v1 }
  0xba   : > { %1210 = vmatpush3.bf16.msra.mxu0 %v1209_v4 }
  0xbb   : > { %1242 = vmatpush3.bf16.msra.mxu1 %v1241_v5  ;;  %1243 = vmatprep.subr.bf16.mxu0 %v1535_v10 }
  0xbd   : > { %623 = vmatmul.mubr.f32.vlgmr.msra.gmra.mrb[2].mxu0 %v269_v8 }
  0xbe   : > { %1245 = vmatpush3.bf16.msra.mxu0 %v1244_v9  ;;  %693 = vmatmul.mubr.f32.vlgmr.msra.gmra.mrb[2].mxu1 %v271_v11 }
  0xbf   : > { %1246 = vmatprep.subr.bf16.mxu0 %v1535_v10  ;;  %1112 = vmatprep.mubr.msk.f32.mxu0 %vm1536_vm0, %v1537_v17 }
  0xc2   : > { %1248 = vmatpush3.bf16.msra.mxu0 %v1247_v14 }
  0xc3   : > { %1249 = vmatprep.subr.bf16.mxu0 %v1535_v10 }
  0xc6   : > { %1251 = vmatpush3.bf16.msra.mxu0 %v1250_v18 }
  0xc7   : > { %1252 = vmatprep.subr.bf16.mxu0 %v1535_v10 }
  0xca   : > { %1254 = vmatpush3.bf16.msra.mxu0 %v1253_v21 }
  0xcb   : > { %1255 = vmatprep.subr.bf16.mxu0 %v1535_v10 }
  0xce   : > { %1257 = vmatpush3.bf16.msra.mxu0 %v1256_v24 }
  0xcf   : > { %1258 = vmatprep.subr.bf16.mxu0 %v1535_v10 }
  0xd2   : > { %1260 = vmatpush3.bf16.msra.mxu0 %v1259_v27 }
  0xd3   : > { %1261 = vmatprep.subr.bf16.mxu0 %v1535_v10 }
  0xd6   : > { %1263 = vmatpush3.bf16.msra.mxu0 %v1262_v30 }
  0xd7   : > { %1264 = vmatprep.subr.bf16.mxu0 %v1535_v10 }
  0xda   : > { %1266 = vmatpush3.bf16.msra.mxu0 %v1265_v33 }
  0xdd   : > { %1113 = vmatmul.mubr.f32.vlgmr.msra.gmra.mrb[4].mxu0 %v273_v34 }
 0x170   : > { %v955_v35 = vpop.f32.mrb[0].mxu0 }
 0x171   : > { %v990_v36 = vpop.f32.mrb[0].mxu1  ;;  %v956_v37 = vpop.f32.mrb[1].mxu0 }
 0x172   : > { %v957_v38 = vadd.f32 %v956_v37, %v955_v35  ;;  %v991_v39 = vpop.f32.mrb[1].mxu1 }
 0x173   : > { %v992_v40 = vadd.f32 %v991_v39, %v990_v36 }
 0x175   : > { %v555_v41 = vadd.f32 %v992_v40, %v957_v38 }
 0x190   : > { %v1025_v42 = vpop.f32.mrb[2].mxu0 }
 0x191   : > { %v1026_v43 = vpop.f32.mrb[3].mxu0  ;;  %v1060_v44 = vpop.f32.mrb[2].mxu1 }
 0x192   : > { %v1027_v45 = vadd.f32 %v1026_v43, %v1025_v42  ;;  %v1061_v46 = vpop.f32.mrb[3].mxu1 }
 0x193   : > { %v1062_v47 = vadd.f32 %v1061_v46, %v1060_v44 }
 0x194   : > { %v625_v48 = vadd.f32 %v1027_v45, %v555_v41 }
 0x196   : > { %v695_v49 = vadd.f32 %v1062_v47, %v625_v48 }
 0x1b0   : > { %v764_v50 = vpop.f32.mrb[4].mxu0 }
 0x1b1   : > { %v765_v52 = vadd.f32 %v764_v50, %v695_v49  ;;  %v1114_v53 = vpop.f32.mrb[5].mxu0 }
 0x1b3   : > { %v781_v54 = vadd.f32 %v918_v51, %v765_v52 }
 0x1b5   : > { %782 = vst [vmem:[%s256_s10] sm:$0xff] %v781_v54 }
 0x1b6   : > { %1454 = shalt.err (!%p1451_p2)
}
 0x1b7   : > { %s1455_s5 = scalar_lea.hbm %s1907_s20, 128  ;;  %s1459_s26 = scalar_lea.hbm %s1959_s3, 256 }
 0x1b8   : > { %p1456_p6 = scmp.ne.s32.totalorder %s1907_s20, %s1455_s5  ;;  %p1460_p8 = scmp.lt.u32.totalorder %s1907_s20, %s1959_s3 }
 0x1b9   : > { %p1461_p5 = scmp.lt.u32.totalorder %s1459_s26, %s1455_s5  ;;  %p1463_p10 = scmp.lt.u32.totalorder %s1455_s5, %s1907_s20 }
 0x1ba   : > { %p1457_p12 = pnand %p1456_p6, %p1978_p13 }
 0x1bb   : > { %p1462_p11 = por %p1461_p5, %p1460_p8 }
 0x1bc   : > { %p1458_p9 = pneg %p1457_p12 }
 0x1bd   : > { %p1464_p1 = por %p1463_p10, %p1462_p11 }
 0x1bf   : > { %p1465_p7 = pnand %p1464_p1, %p1458_p9 }
 0x1c1   : > { %1468 = shalt.err (!%p1465_p7)
}
 0x1c2   : > { %1277 = dma.vmem_to_hbm [thread:$0]  (%p1978_p13), %s1909_s27, 128, %s1907_s20, %s784_s22  }
 0x1c3 PF: > { %s809_s30 = sand.u32 1, %s1507_s12   ;;  %p1979_p4 = scmp.ne.s32.totalorder %s1970_s4, 0 }
 0x1c4   : > { %p1980_p0 = scmp.ge.s32.totalorder %s1527_s17, 2  ;;  %s810_s7 = scalar_lea.sflag [#allocation5], %s809_s30 }
 0x1c6   : > { %p1291_p3 = pnand %p1980_p0, %p1979_p4 }
 0x1c8   : > { %1502 = dma.done.wait (!%p1291_p3), %s810_s7, 128  }
 0x1c9   : > { %1504 = vsyncadd (!%p1291_p3), %s810_s7, 4294967168  ;;  %s20_s17 = sadd.s32 1, %s1527_s17   ;;  %s1981_s12 = smov %s1511_s13 }
 0x1ca   : > { %p17_p2 = scmp.ge.s32.totalorder %s20_s17, 4   ;;  %s1982_s13 = smov %s1515_s14 }
 0x1cb   : > { %s1983_s14 = smov %s1607_s24  ;;  %s1984_s15 = smov %s1523_s16 }
 0x1cc   : > { %s1985_s16 = smov %s1987_s18  ;;  %19 = sbr.rel (!%p17_p2) target bundleno = 9 (0x9), region = 102 }
 0x1d3   :  { %815 = vsyncpa [#allocation4], 1 }
 0x1d4   :  { %817 = vsyncpa [#allocation4 + $0x1], 1 }
 0x1d5   :  { %818 = vsyncpa [#allocation7], 1 }
 0x1d6   :  { %820 = vsyncpa [#allocation7 + $0x1], 1 }
 0x1d7   :  { %821 = vsyncpa [#allocation5], 1 }
 0x1d8   :  { %823 = vsyncpa [#allocation5 + $0x1], 1 }

</bundles_post_ra>
